<compile_context>
chip_gen: v7x
topology: tpu7x:2x2x1
jax: 0.10.0
libtpu: 0.0.40
codegen_flags: <defaults>
</compile_context>

<pallas_src>
import functools

import jax
import jax.numpy as jnp
from jax.experimental import pallas as pl
from jax.experimental.pallas import tpu as pltpu

LANE = 128
MAX_BLOCK_ROWS = 4096          # 4096 x 128 x 4B = 2 MiB per f32 input buffer
VMEM_LIMIT_BYTES = 32 << 20    # safe on v5e/v6e (128 MiB) and v7x (64 MiB)


# ---------------- Pallas kernels (hot path) ----------------

def _sq_err_sum_kernel(p_ref, t_ref, o_ref, acc_ref, *,
                       block_rows, blocks_per_part, total_rows, need_mask):
    """Per-partition sum((pred - target)^2) with a VMEM elementwise accumulator."""
    i = pl.program_id(1)

    @pl.when(i == 0)
    def _():
        acc_ref[...] = jnp.zeros_like(acc_ref)

    d = p_ref[...].astype(jnp.float32) - t_ref[...].astype(jnp.float32)
    sq = d * d
    if need_mask:
        blk = pl.program_id(0) * blocks_per_part + i
        row = blk * block_rows + jax.lax.broadcasted_iota(jnp.int32, sq.shape, 0)
        sq = jnp.where(row < total_rows, sq, jnp.float32(0.0))
    acc_ref[...] += sq

    @pl.when(i == pl.num_programs(1) - 1)
    def _():
        o_ref[0, 0] = jnp.sum(acc_ref[...])


def _wsq_err_sum_kernel(p_ref, t_ref, w_ref, o_ref, acc_ref, *,
                        block_rows, blocks_per_part, total_rows, need_mask):
    """Per-partition sum(weight * (pred - target)^2)."""
    i = pl.program_id(1)

    @pl.when(i == 0)
    def _():
        acc_ref[...] = jnp.zeros_like(acc_ref)

    d = p_ref[...].astype(jnp.float32) - t_ref[...].astype(jnp.float32)
    sq = d * d * w_ref[...].astype(jnp.float32)
    if need_mask:
        blk = pl.program_id(0) * blocks_per_part + i
        row = blk * block_rows + jax.lax.broadcasted_iota(jnp.int32, sq.shape, 0)
        sq = jnp.where(row < total_rows, sq, jnp.float32(0.0))
    acc_ref[...] += sq

    @pl.when(i == pl.num_programs(1) - 1)
    def _():
        o_ref[0, 0] = jnp.sum(acc_ref[...])


def _sq_err_elem_kernel(p_ref, t_ref, o_ref, *, scale):
    d = p_ref[...].astype(jnp.float32) - t_ref[...].astype(jnp.float32)
    o_ref[...] = (jnp.float32(scale) * (d * d)).astype(o_ref.dtype)


def _wsq_err_elem_kernel(p_ref, t_ref, w_ref, o_ref, *, scale):
    d = p_ref[...].astype(jnp.float32) - t_ref[...].astype(jnp.float32)
    o_ref[...] = (jnp.float32(scale) * (d * d) *
                  w_ref[...].astype(jnp.float32)).astype(o_ref.dtype)


# ---------------- glue: 2-D view / pallas_call wrappers ----------------

def _to_2d(x):
    """View x as a lane-dense (rows, 128) slab. Zero-copy when size % 128 == 0."""
    flat = x.reshape(-1)
    n = flat.shape[0]
    if n % LANE != 0:
        # Rare ragged-lane case; zero padding contributes 0 to the squared-error
        # sum and is sliced off again for reduction='none'.
        flat = jnp.pad(flat, (0, LANE - n % LANE))
    return flat.reshape(flat.shape[0] // LANE, LANE)


def _sq_err_sum(pred, target, weight=None):
    """Scalar f32: sum of (optionally weighted) squared error."""
    if weight is not None and weight.shape != pred.shape:
        # TODO(synk): channel-broadcast weights (N,1,H,W) are materialized here;
        # a dedicated per-(N,C,HW) BlockSpec path would avoid the extra HBM pass.
        weight = jnp.broadcast_to(weight, pred.shape)

    p2d = _to_2d(pred)
    t2d = _to_2d(target)
    rows = p2d.shape[0]
    block_rows = min(rows, MAX_BLOCK_ROWS)          # full-array block if small
    total_blocks = pl.cdiv(rows, block_rows)
    partitions = 2 if total_blocks >= 2 else 1      # dual-TensorCore split (v7x)
    bpp = pl.cdiv(total_blocks, partitions)         # blocks per partition
    need_mask = partitions * bpp * block_rows != rows

    if partitions * bpp > total_blocks:
        # Extra trailing blocks in the last partition: clamp the load (the
        # in-kernel mask zeroes their contribution, so no double counting).
        def in_map(p, i):
            return (jnp.minimum(p * bpp + i, total_blocks - 1), 0)
    else:
        def in_map(p, i):
            return (p * bpp + i, 0)

    in_blk = pl.BlockSpec((block_rows, LANE), in_map)
    out_spec = pl.BlockSpec((1, 1), lambda p, i: (p, 0), memory_space=pltpu.SMEM)

    n = pred.size
    itemsize = pred.dtype.itemsize
    if weight is None:
        kernel = functools.partial(
            _sq_err_sum_kernel, block_rows=block_rows, blocks_per_part=bpp,
            total_rows=rows, need_mask=need_mask)
        operands = (p2d, t2d)
        flops = 3 * n
    else:
        w2d = _to_2d(weight)
        kernel = functools.partial(
            _wsq_err_sum_kernel, block_rows=block_rows, blocks_per_part=bpp,
            total_rows=rows, need_mask=need_mask)
        operands = (p2d, t2d, w2d)
        flops = 4 * n
    nbytes = len(operands) * n * itemsize + 4 * partitions

    partial_sums = pl.pallas_call(
        kernel,
        out_shape=jax.ShapeDtypeStruct((partitions, 1), jnp.float32),
        grid=(partitions, bpp),
        in_specs=[in_blk] * len(operands),
        out_specs=out_spec,
        scratch_shapes=[pltpu.VMEM((block_rows, LANE), jnp.float32)],
        compiler_params=pltpu.CompilerParams(
            dimension_semantics=("parallel", "arbitrary"),
            vmem_limit_bytes=VMEM_LIMIT_BYTES),
        cost_estimate=pl.CostEstimate(
            flops=flops, transcendentals=0, bytes_accessed=nbytes),
    )(*operands)
    return jnp.sum(partial_sums)


def _sq_err_none(pred, target, weight, loss_weight):
    """Elementwise loss_weight * weight * (pred - target)^2, shape of pred."""
    if weight is not None and weight.shape != pred.shape:
        # TODO(synk): see note in _sq_err_sum about channel-broadcast weights.
        weight = jnp.broadcast_to(weight, pred.shape)

    n = pred.size
    p2d = _to_2d(pred)
    t2d = _to_2d(target)
    rows = p2d.shape[0]
    block_rows = min(rows, MAX_BLOCK_ROWS)
    grid = (pl.cdiv(rows, block_rows),)
    blk = pl.BlockSpec((block_rows, LANE), lambda i: (i, 0))

    if weight is None:
        kernel = functools.partial(_sq_err_elem_kernel, scale=float(loss_weight))
        operands = (p2d, t2d)
    else:
        w2d = _to_2d(weight)
        kernel = functools.partial(_wsq_err_elem_kernel, scale=float(loss_weight))
        operands = (p2d, t2d, w2d)

    itemsize = pred.dtype.itemsize
    nbytes = (len(operands) + 1) * n * itemsize
    out2d = pl.pallas_call(
        kernel,
        out_shape=jax.ShapeDtypeStruct(p2d.shape, pred.dtype),
        grid=grid,
        in_specs=[blk] * len(operands),
        out_specs=blk,
        compiler_params=pltpu.CompilerParams(
            dimension_semantics=("parallel",),
            vmem_limit_bytes=VMEM_LIMIT_BYTES),
        cost_estimate=pl.CostEstimate(
            flops=(len(operands) + 1) * n, transcendentals=0,
            bytes_accessed=nbytes),
    )(*operands)

    flat = out2d.reshape(-1)
    if flat.shape[0] != n:          # only in the ragged-lane (padded) case
        flat = flat[:n]
    return flat.reshape(pred.shape)


class MSELoss:
    """MSE (L2) loss, Pallas-TPU implementation of basicsr MSELoss.forward."""

    def __init__(self, loss_weight=1.0, reduction='mean'):
        if reduction not in ('none', 'mean', 'sum'):
            raise ValueError(f'Unsupported reduction mode: {reduction}. '
                             f"Supported ones are: ['none', 'mean', 'sum']")
        self.loss_weight = float(loss_weight)
        self.reduction = reduction

    def __call__(self, pred, target, weight=None):
        if self.reduction == 'none':
            return _sq_err_none(pred, target, weight, self.loss_weight)

        s = _sq_err_sum(pred, target, weight)  # scalar f32, weighted sq-err sum

        if self.reduction == 'sum':
            return (self.loss_weight * s).astype(pred.dtype)

        # reduction == 'mean'
        if weight is None:
            denom = jnp.float32(pred.size)
        else:
            # basicsr weight_reduce_loss: mean over the weighted region.
            # Single-channel weights are implicitly broadcast over C.
            c = pred.shape[1]
            wsum = jnp.sum(weight.astype(jnp.float32))
            denom = wsum if weight.shape[1] > 1 else wsum * c
        return (self.loss_weight * s / denom).astype(pred.dtype)


if __name__ == "__main__":
    key = jax.random.PRNGKey(0)
    k1, k2, k3 = jax.random.split(key, 3)
    N, C, H, W = 2, 4, 16, 16
    pred = jax.random.normal(k1, (N, C, H, W), dtype=jnp.float32)
    target = jax.random.normal(k2, (N, C, H, W), dtype=jnp.float32)
    weight = jax.random.uniform(k3, (N, C, H, W), dtype=jnp.float32)

    # mean (default), no weight
    loss_mean = MSELoss(loss_weight=1.0, reduction='mean')(pred, target)
    jax.block_until_ready(loss_mean)
    ref_mean = jnp.mean((pred - target) ** 2)
    assert jnp.allclose(loss_mean, ref_mean, rtol=1e-5, atol=1e-5)

    # sum with loss_weight
    loss_sum = MSELoss(loss_weight=0.5, reduction='sum')(pred, target)
    jax.block_until_ready(loss_sum)
    ref_sum = 0.5 * jnp.sum((pred - target) ** 2)
    assert jnp.allclose(loss_sum, ref_sum, rtol=1e-5, atol=1e-4)

    # none with elementwise weight
    loss_none = MSELoss(loss_weight=2.0, reduction='none')(pred, target, weight)
    jax.block_until_ready(loss_none)
    ref_none = 2.0 * weight * (pred - target) ** 2
    assert loss_none.shape == (N, C, H, W)
    assert jnp.allclose(loss_none, ref_none, rtol=1e-5, atol=1e-5)

    # mean with elementwise weight (basicsr: divide by weight sum)
    loss_wmean = MSELoss(loss_weight=1.0, reduction='mean')(pred, target, weight)
    jax.block_until_ready(loss_wmean)
    ref_wmean = jnp.sum(weight * (pred - target) ** 2) / jnp.sum(weight)
    assert jnp.allclose(loss_wmean, ref_wmean, rtol=1e-5, atol=1e-5)

    # larger case exercising multi-block grid, 2-way partition split and the
    # ragged-tail row mask (rows = 12288 -> 3 blocks of 4096, 2 partitions,
    # clamped redundant block in the last partition)
    kb1, kb2 = jax.random.split(jax.random.PRNGKey(1))
    big_p = jax.random.normal(kb1, (2, 3, 512, 512), dtype=jnp.float32)
    big_t = jax.random.normal(kb2, (2, 3, 512, 512), dtype=jnp.float32)
    loss_big = MSELoss(loss_weight=1.0, reduction='mean')(big_p, big_t)
    jax.block_until_ready(loss_big)
    ref_big = jnp.mean((big_p - big_t) ** 2)
    assert jnp.allclose(loss_big, ref_big, rtol=1e-5, atol=1e-5)

    # mid case: rows = 1200 < 4096 -> single full-array block per TensorCore path
    km1, km2 = jax.random.split(jax.random.PRNGKey(3))
    mid_p = jax.random.normal(km1, (2, 3, 160, 160), dtype=jnp.float32)
    mid_t = jax.random.normal(km2, (2, 3, 160, 160), dtype=jnp.float32)
    loss_mid = MSELoss(loss_weight=1.0, reduction='mean')(mid_p, mid_t)
    jax.block_until_ready(loss_mid)
    ref_mid = jnp.mean((mid_p - mid_t) ** 2)
    assert jnp.allclose(loss_mid, ref_mid, rtol=1e-5, atol=1e-5)

    # ragged-lane case (numel % 128 != 0) hits the small pad fallback
    ko1, ko2 = jax.random.split(jax.random.PRNGKey(2))
    odd_p = jax.random.normal(ko1, (2, 3, 5, 7), dtype=jnp.float32)
    odd_t = jax.random.normal(ko2, (2, 3, 5, 7), dtype=jnp.float32)
    loss_odd = MSELoss(loss_weight=1.0, reduction='mean')(odd_p, odd_t)
    jax.block_until_ready(loss_odd)
    ref_odd = jnp.mean((odd_p - odd_t) ** 2)
    assert jnp.allclose(loss_odd, ref_odd, rtol=1e-5, atol=1e-5)

    print("KERNEL_OK")
</pallas_src>

<mosaic_0001>
module attributes {stable_mosaic.version = 11 : i64} {
  func.func @_sq_err_sum_kernel(%arg0: i32, %arg1: i32, %arg2: memref<16x128xf32, #tpu.memory_space<vmem>>, %arg3: memref<16x128xf32, #tpu.memory_space<vmem>>, %arg4: memref<1x1xf32, #tpu.memory_space<smem>>, %arg5: memref<16x128xf32, #tpu.memory_space<vmem>>) attributes {dimension_semantics = [#tpu.dimension_semantics<parallel>, #tpu.dimension_semantics<arbitrary>], iteration_bounds = array<i64: 1, 1>, scalar_prefetch = 0 : i64, scratch_operands = 1 : i64, tpu.core_type = #tpu.core_type<tc>, window_params = [{transform_indices = @transform_0, window_bounds = array<i64: 16, 128>}, {transform_indices = @transform_1, window_bounds = array<i64: 16, 128>}, {transform_indices = @transform_2, window_bounds = array<i64: 1, 1>}]} {
    %c0_i32 = arith.constant 0 : i32
    %0 = arith.cmpi eq, %arg1, %c0_i32 : i32
    %1 = arith.extui %0 : i1 to i32
    %c0_i32_0 = arith.constant 0 : i32
    %2 = arith.cmpi ne, %1, %c0_i32_0 : i32
    scf.if %2 {
      %cst = arith.constant 0.000000e+00 : f32
      %13 = vector.broadcast %cst : f32 to vector<16x128xf32>
      %c0_10 = arith.constant 0 : index
      %c0_11 = arith.constant 0 : index
      %14 = vector.load %arg5[%c0_10, %c0_11] : memref<16x128xf32, #tpu.memory_space<vmem>>, vector<16x128xf32>
      tpu.vector_store %arg5[%c0_10, %c0_11], %13 {strides = array<i32>} : memref<16x128xf32, #tpu.memory_space<vmem>>, vector<16x128xf32>,
    } else {
    }
    %c0 = arith.constant 0 : index
    %c0_1 = arith.constant 0 : index
    %3 = vector.load %arg2[%c0, %c0_1] : memref<16x128xf32, #tpu.memory_space<vmem>>, vector<16x128xf32>
    %c0_2 = arith.constant 0 : index
    %c0_3 = arith.constant 0 : index
    %4 = vector.load %arg3[%c0_2, %c0_3] : memref<16x128xf32, #tpu.memory_space<vmem>>, vector<16x128xf32>
    %5 = arith.subf %3, %4 : vector<16x128xf32>
    %6 = arith.mulf %5, %5 : vector<16x128xf32>
    %c0_4 = arith.constant 0 : index
    %c0_5 = arith.constant 0 : index
    %7 = vector.load %arg5[%c0_4, %c0_5] : memref<16x128xf32, #tpu.memory_space<vmem>>, vector<16x128xf32>
    %8 = arith.addf %7, %6 : vector<16x128xf32>
    %c0_6 = arith.constant 0 : index
    %c0_7 = arith.constant 0 : index
    %9 = vector.load %arg5[%c0_6, %c0_7] : memref<16x128xf32, #tpu.memory_space<vmem>>, vector<16x128xf32>
    tpu.vector_store %arg5[%c0_6, %c0_7], %8 {strides = array<i32>} : memref<16x128xf32, #tpu.memory_space<vmem>>, vector<16x128xf32>,
    %c0_i32_8 = arith.constant 0 : i32
    %10 = arith.cmpi eq, %arg1, %c0_i32_8 : i32
    %11 = arith.extui %10 : i1 to i32
    %c0_i32_9 = arith.constant 0 : i32
    %12 = arith.cmpi ne, %11, %c0_i32_9 : i32
    scf.if %12 {
      %c0_10 = arith.constant 0 : index
      %c0_11 = arith.constant 0 : index
      %13 = vector.load %arg5[%c0_10, %c0_11] : memref<16x128xf32, #tpu.memory_space<vmem>>, vector<16x128xf32>
      %14 = vector.shape_cast %13 : vector<16x128xf32> to vector<1x16x128xf32>
      %cst = arith.constant dense<0.000000e+00> : vector<1xf32>
      %15 = vector.multi_reduction <add>, %14, %cst [1, 2] : vector<1x16x128xf32> to vector<1xf32>
      %16 = vector.shape_cast %15 : vector<1xf32> to vector<1x1x1xf32>
      %17 = vector.extract %16[0, 0, 0] : f32 from vector<1x1x1xf32>
      %c0_12 = arith.constant 0 : index
      %c0_13 = arith.constant 0 : index
      %18 = memref.load %arg4[%c0_12, %c0_13] : memref<1x1xf32, #tpu.memory_space<smem>>
      memref.store %17, %arg4[%c0_12, %c0_13] : memref<1x1xf32, #tpu.memory_space<smem>>
    } else {
    }
    return
  }
  func.func @transform_0(%arg0: i32, %arg1: i32) -> (i32, i32) {
    %c1_i32 = arith.constant 1 : i32
    %0 = arith.muli %arg0, %c1_i32 : i32
    %1 = arith.addi %0, %arg1 : i32
    %c0_i32 = arith.constant 0 : i32
    %c0_i32_0 = arith.constant 0 : i32
    return %1, %c0_i32 : i32, i32
  }
  func.func @transform_1(%arg0: i32, %arg1: i32) -> (i32, i32) {
    %c1_i32 = arith.constant 1 : i32
    %0 = arith.muli %arg0, %c1_i32 : i32
    %1 = arith.addi %0, %arg1 : i32
    %c0_i32 = arith.constant 0 : i32
    %c0_i32_0 = arith.constant 0 : i32
    return %1, %c0_i32 : i32, i32
  }
  func.func @transform_2(%arg0: i32, %arg1: i32) -> (i32, i32) {
    %c0_i32 = arith.constant 0 : i32
    %c0_i32_0 = arith.constant 0 : i32
    return %arg0, %c0_i32 : i32, i32
  }
}

</mosaic_0001>

<bundles_post_ra>
// kernel: tpu_custom_call.1
= control target key start
LH: loop header
LB: loop body
LE: loop exit
PB: predicated region body
PF: predicated region fallthrough
CT: control target
= control target key end

     0   :  { %7 = vsyncpa [#allocation4], 0  ;;  %s227_s0 = inlined_call_operand.hbm [shape: f32[16,128], index: 0, kind: input, shape index: {}]   ;;  %s228_s1 = inlined_call_operand.hbm [shape: f32[16,128], index: 1, kind: input, shape index: {}]   ;;  %s229_s2 = inlined_call_operand.hbm [shape: f32[1,1], index: 2, kind: output, shape index: {}]  }
   0x1   :  { %8 = vsyncpa [#allocation7], 0 }
   0x2   :  { %9 = vsyncpa [#allocation5], 0  ;;  %s171_s9 = smov [#allocation3]   ;;  %s111_s13 = scalar_lea.hbm %s227_s0, 256 }
   0x3   :  { %s19_s10 = sshll.u32 %s171_s9, 4  ;;  %p112_p0 = scmp.ne.s32.totalorder %s227_s0, %s111_s13  ;;  %s20_s10 = int_to_ptr.vmem [resolvable:$true] %s19_s10 }
   0x4   :  { %p115_p1 = scmp.lt.u32.totalorder %s111_s13, %s227_s0 }
   0x6   :  { %p117_p2 = pnand %p115_p1, %p112_p0 }
   0x8   :  { %120 = shalt.err (!%p117_p2)
}
   0x9   :  { %s121_s18 = scalar_lea.vmem %s20_s10, 256  ;;  %p126_p4 = scmp.lt.s32.totalorder %s20_s10, %s20_s10 }
   0xa   :  { %p122_p3 = scmp.ne.s32.totalorder %s20_s10, %s121_s18  ;;  %p127_p5 = scmp.lt.s32.totalorder %s121_s18, %s121_s18 }
   0xc   :  { %p128_p6 = por %p127_p5, %p126_p4 }
   0xe   :  { %p129_p7 = pnand %p128_p6, %p122_p3 }
  0x10   :  { %132 = shalt.err (!%p129_p7)
}
  0x11   :  { %s172_s19 = smov 128   ;;  %s173_s20 = smov 8  }
  0x12   :  { %25 = dma.hbm_to_vmem [thread:$0]  %s227_s0, 256, %s20_s10, [#allocation4], %s172_s19, %s172_s19, %s173_s20  }
  0x13   :  { %s174_s23 = smov [#allocation6]   ;;  %s133_s27 = scalar_lea.hbm %s228_s1, 256 }
  0x14   :  { %s35_s24 = sshll.u32 %s174_s23, 4  ;;  %p134_p8 = scmp.ne.s32.totalorder %s228_s1, %s133_s27  ;;  %s36_s24 = int_to_ptr.vmem [resolvable:$true] %s35_s24 }
  0x15   :  { %p137_p9 = scmp.lt.u32.totalorder %s133_s27, %s228_s1 }
  0x17   :  { %p139_p10 = pnand %p137_p9, %p134_p8 }
  0x19   :  { %142 = shalt.err (!%p139_p10)
}
  0x1a   :  { %s143_s4 = scalar_lea.vmem %s36_s24, 256  ;;  %p148_p12 = scmp.lt.s32.totalorder %s36_s24, %s36_s24 }
  0x1b   :  { %p144_p11 = scmp.ne.s32.totalorder %s36_s24, %s143_s4  ;;  %p149_p13 = scmp.lt.s32.totalorder %s143_s4, %s143_s4 }
  0x1d   :  { %p150_p0 = por %p149_p13, %p148_p12 }
  0x1f   :  { %p151_p1 = pnand %p150_p0, %p144_p11 }
  0x21   :  { %154 = shalt.err (!%p151_p1)
}
  0x22   :  { %41 = dma.hbm_to_vmem [thread:$0]  %s228_s1, 256, %s36_s24, [#allocation7], %s172_s19, %s172_s19, %s173_s20  }
  0x23   :  { %165 = dma.done.wait [#allocation4], 256  }
  0x24   :  { %166 = vsyncadd [#allocation4], 4294967040 }
  0x25   :  { %167 = dma.done.wait [#allocation7], 256  }
  0x26   :  { %168 = vsyncadd [#allocation7], 4294967040  ;;  %v58_v0 = vld [vmem:[#allocation3] sm:$0xff]  ;;  %v59_v1 = vld [vmem:[#allocation3 + $0x8] sm:$0xff]  ;;  %s155_s8 = scalar_lea.hbm %s229_s2, 16 }
  0x27   :  { %v60_v2 = vld [vmem:[#allocation6] sm:$0xff]  ;;  %v61_v3 = vld [vmem:[#allocation6 + $0x8] sm:$0xff]  ;;  %p156_p2 = scmp.ne.s32.totalorder %s229_s2, %s155_s8  ;;  %p159_p3 = scmp.lt.u32.totalorder %s155_s8, %s229_s2 }
  0x28   :  { %v62_v4 = vsub.f32 %v58_v0, %v60_v2  ;;  %v63_v5 = vsub.f32 %v59_v1, %v61_v3 }
  0x29   :  { %p161_p4 = pnand %p159_p3, %p156_p2 }
  0x2a   :  { %v64_v6 = vmul.f32 %v62_v4, %v62_v4  ;;  %v65_v7 = vmul.f32 %v63_v5, %v63_v5 }
  0x2c   :  { %v77_v8 = vadd.f32 %v65_v7, %v64_v6 }
  0x2e   :  { %78 = vadd.xlane.f32.xlu0 %v77_v8 }
  0xbb   :  { %v79_v9 = vpop.xlane.xlu0 %78 }
  0xbc   :  { %v80_v10 = vrot.slane %v79_v9, 4 }
  0xbe   :  { %v81_v11 = vadd.f32 %v80_v10, %v79_v9 }
  0xc0   :  { %v82_v12 = vrot.slane %v81_v11, 2 }
  0xc2   :  { %v83_v13 = vadd.f32 %v82_v12, %v81_v11 }
  0xc4   :  { %v84_v14 = vrot.slane %v83_v13, 1 }
  0xc6   :  { %v85_v15 = vadd.f32 %v84_v14, %v83_v13 }
  0xc8   :  { %104 = vpush %v85_v15 }
  0xf9   :  { %s105_s1 = spop %104 }
  0xfa   :  { %88 = sst [smem:[#allocation8]] %s105_s1 }
  0xfb   :  { %164 = shalt.err (!%p161_p4)
}
  0xfc   :  { %s175_s13 = smov [#allocation8]  }
  0xfd   :  { %96 = dma.smem_to_hbm %s175_s13, 16, %s229_s2, [#allocation5]  }
  0xfe   :  { %169 = dma.done.wait [#allocation5], 16  }
  0xff   :  { %170 = vsyncadd [#allocation5], 4294967280 }
 0x100   :  { %100 = sfence }
 0x101   :  { %101 = vsyncpa [#allocation4], 1 }
 0x102   :  { %102 = vsyncpa [#allocation7], 1 }
 0x103   :  { %103 = vsyncpa [#allocation5], 1 }

</bundles_post_ra>
